<compile_context>
chip_gen: v6e
topology: v6e:2x2x1
jax: 0.10.0
libtpu: 0.0.40
codegen_flags: <defaults>
</compile_context>

<pallas_src>
import itertools

import jax
import jax.numpy as jnp
import numpy as np
from jax.experimental import pallas as pl
from jax.experimental.pallas import tpu as pltpu

# Matcher weights (module __init__ defaults).  Trace-time Python constants.
W_CLS = 1.0
W_L1 = 1.0
W_GIOU = 1.0

LANE = 128
SUBLANE = 8
NUM_LABEL_FEATS = 9   # lx, ly, lw, lh, x0, y0, x1, y1, area


def _round_up(x, m):
    return ((x + m - 1) // m) * m


def _recip(x):
    """1/x on the EUP (approx) + one Newton step -> ~f32-exact, keeps divides
    off the VPU critical path while preserving assignment parity."""
    r = pl.reciprocal(x, approx=True)
    return r * (2.0 - x * r)


def _cost_block_kernel(pred_cls_ref, pred_bb_ref, neg_onehot_t_ref,
                       label_feat_ref, out_ref):
    """One (tm, n_pad) tile of batch b's cost block.

    pred_cls_ref:     (tm, C1)               f32  predictions for tm queries
    pred_bb_ref:      (tm, 4)                f32  (xc, yc, w, h)
    neg_onehot_t_ref: (C1, n_pad)            f32  -W_CLS * one-hot(target cls)^T
    label_feat_ref:   (NUM_LABEL_FEATS, n_pad) f32 precomputed label features
    out_ref:          (tm, n_pad)            f32  cost tile
    """
    # ---- classification cost: one-hot gather on the MXU. --------------------
    # The one-hot columns are pre-scaled by -W_CLS, so the matmul directly
    # yields  w_cls * (-P[q, cls_j])  (exact: one nonzero term per column).
    cost = jnp.dot(pred_cls_ref[...], neg_onehot_t_ref[...],
                   preferred_element_type=jnp.float32)              # (tm, N)

    pb = pred_bb_ref[...]                                           # (tm, 4)
    px = pb[:, 0:1]; py = pb[:, 1:2]; pw = pb[:, 2:3]; ph = pb[:, 3:4]
    p_x0 = px - 0.5 * pw; p_y0 = py - 0.5 * ph
    p_x1 = px + 0.5 * pw; p_y1 = py + 0.5 * ph
    area_p = (p_x1 - p_x0) * (p_y1 - p_y0)                          # (tm, 1)

    lab = label_feat_ref[...]                                       # (9, N)
    lx = lab[0:1]; ly = lab[1:2]; lw = lab[2:3]; lh = lab[3:4]
    l_x0 = lab[4:5]; l_y0 = lab[5:6]; l_x1 = lab[6:7]; l_y1 = lab[7:8]
    area_l = lab[8:9]

    # ---- L1 / cdist(p=1) on (xc, yc, w, h). ----------------------------------
    l1 = (jnp.abs(px - lx) + jnp.abs(py - ly) +
          jnp.abs(pw - lw) + jnp.abs(ph - lh))                      # (tm, N)
    if W_L1 == 1.0:
        cost = cost + l1
    else:
        cost = cost + W_L1 * l1

    # ---- generalized IoU, accumulated term-by-term into the running cost. ---
    iw = jnp.maximum(jnp.minimum(p_x1, l_x1) - jnp.maximum(p_x0, l_x0), 0.0)
    ih = jnp.maximum(jnp.minimum(p_y1, l_y1) - jnp.maximum(p_y0, l_y0), 0.0)
    inter = iw * ih                                                 # (tm, N)
    union = area_p + area_l - inter                                 # (tm, N)
    # IoU term first: inter / recip(union) become dead before enc is live.
    if W_GIOU == 1.0:
        cost = cost - inter * _recip(union)
    else:
        cost = cost - W_GIOU * (inter * _recip(union))
    enc = ((jnp.maximum(p_x1, l_x1) - jnp.minimum(p_x0, l_x0)) *
           (jnp.maximum(p_y1, l_y1) - jnp.minimum(p_y0, l_y0)))     # (tm, N)
    #  -(enc - union)/enc  folded as  (1 - union/enc)  to reuse `union`.
    if W_GIOU == 1.0:
        cost = cost + (1.0 - union * _recip(enc))
    else:
        cost = cost + W_GIOU * (1.0 - union * _recip(enc))

    # Reference clamps the cost matrix to [-1e20, 1e20] (NaN passes through,
    # same as the reference clamp).
    out_ref[...] = jnp.clip(cost, -1e20, 1e20)


def compute_cost_matrices(pred_cls, pred_bb, neg_onehot_t, label_feats,
                          *, row_tile=1024):
    """pred_cls (B,Q,C1), pred_bb (B,Q,4), neg_onehot_t (B,C1,n_pad),
    label_feats (B,NUM_LABEL_FEATS,n_pad).

    Returns the (B, q_pad, n_pad) f32 per-batch cost blocks (still padded).
    """
    B, Q, C1 = pred_cls.shape
    n_pad = neg_onehot_t.shape[-1]

    # Row tiling: whole (8-aligned) Q per step when it fits a 1024-row tile,
    # otherwise 1024-row tiles.  The batch grid axis guarantees >= B steps,
    # so both v7x TensorCores get work even when Q is small.
    q_pad8 = _round_up(max(Q, SUBLANE), SUBLANE)
    if q_pad8 <= row_tile:
        tm = q_pad8
        q_pad = q_pad8
    else:
        tm = row_tile
        q_pad = _round_up(Q, tm)

    pred_cls = pred_cls.astype(jnp.float32)
    pred_bb = pred_bb.astype(jnp.float32)
    if q_pad != Q:
        pred_cls = jnp.pad(pred_cls, ((0, 0), (0, q_pad - Q), (0, 0)))
        pred_bb = jnp.pad(pred_bb, ((0, 0), (0, q_pad - Q), (0, 0)))

    return pl.pallas_call(
        _cost_block_kernel,
        out_shape=jax.ShapeDtypeStruct((B, q_pad, n_pad), jnp.float32),
        grid=(B, q_pad // tm),
        in_specs=[
            pl.BlockSpec((None, tm, C1), lambda b, i: (b, i, 0)),
            pl.BlockSpec((None, tm, 4), lambda b, i: (b, i, 0)),
            pl.BlockSpec((None, C1, n_pad), lambda b, i: (b, 0, 0)),
            pl.BlockSpec((None, NUM_LABEL_FEATS, n_pad), lambda b, i: (b, 0, 0)),
        ],
        out_specs=pl.BlockSpec((None, tm, n_pad), lambda b, i: (b, i, 0)),
        compiler_params=pltpu.CompilerParams(
            # Megacore on v7x: both axes are independent; no-op on v5e/v6e.
            dimension_semantics=("parallel", "parallel"),
            # VMEM is never the constraint here (few MiB even at tm=1024).
            vmem_limit_bytes=32 * 1024 * 1024,
        ),
    )(pred_cls, pred_bb, neg_onehot_t, label_feats)


def _prepare_label_tensors(label_classification, label_bounding_box, num_classes1):
    """Per-batch label tensors, padded to a lane-dense (multiple-of-128) width.

    Returns (neg_onehot_t (B,C1,n_pad), label_feats (B,9,n_pad), n_list).
    """
    n_list = [int(bb.shape[0]) for bb in label_bounding_box]
    n_pad = max(LANE, _round_up(max(n_list), LANE))

    neg_oh, feats = [], []
    for cls_b, bb_b in zip(label_classification, label_bounding_box):
        n_b = int(bb_b.shape[0])
        idx = jnp.argmax(cls_b, axis=-1)
        # Fold -W_CLS into the one-hot so the kernel's matmul needs no scaling.
        oh_t = (-W_CLS) * jax.nn.one_hot(idx, num_classes1, dtype=jnp.float32).T
        bb = bb_b.astype(jnp.float32)
        lx, ly, lw, lh = bb[:, 0], bb[:, 1], bb[:, 2], bb[:, 3]
        l_x0 = lx - 0.5 * lw
        l_y0 = ly - 0.5 * lh
        l_x1 = lx + 0.5 * lw
        l_y1 = ly + 0.5 * lh
        area_l = (l_x1 - l_x0) * (l_y1 - l_y0)
        ft = jnp.stack([lx, ly, lw, lh, l_x0, l_y0, l_x1, l_y1, area_l], axis=0)
        pad = n_pad - n_b
        neg_oh.append(jnp.pad(oh_t, ((0, 0), (0, pad))))
        feats.append(jnp.pad(ft, ((0, 0), (0, pad))))
    return jnp.stack(neg_oh, axis=0), jnp.stack(feats, axis=0), n_list


# ----------------------- host-side Hungarian assignment -----------------------
def _linear_sum_assignment(cost):
    """Exact min-cost assignment (rows >= cols).  Uses scipy if present, else
    brute force (only suitable for the tiny shapes of this matcher)."""
    try:
        from scipy.optimize import linear_sum_assignment as lsa
        r, c = lsa(cost)
        return np.asarray(r), np.asarray(c)
    except Exception:
        n_rows, n_cols = cost.shape
        best, best_cost = None, np.inf
        for perm in itertools.permutations(range(n_rows), n_cols):
            s = sum(cost[perm[j], j] for j in range(n_cols))
            if s < best_cost:
                best_cost, best = s, perm
        pairs = sorted(zip(best, range(n_cols)))
        rows = np.array([p[0] for p in pairs])
        cols = np.array([p[1] for p in pairs])
        return rows, cols


def hungarian_matcher_forward(prediction_classification, prediction_bounding_box,
                              label_classification, label_bounding_box):
    """Mirrors HungarianMatcher.forward.

    prediction_classification: (B, Q, C+1) f32
    prediction_bounding_box:   (B, Q, 4)   f32 (xc, yc, w, h)
    label_classification:      list of (n_b, C+1) one-hot f32
    label_bounding_box:        list of (n_b, 4) f32 (xc, yc, w, h)
    returns: list of (pred_idx int32 array, label_idx int32 array) per batch elem
    """
    B, Q, C1 = prediction_classification.shape
    neg_onehot_t, label_feats, n_list = _prepare_label_tensors(
        label_classification, label_bounding_box, C1)

    cost = compute_cost_matrices(prediction_classification,
                                 prediction_bounding_box,
                                 neg_onehot_t, label_feats)
    cost = np.asarray(jax.block_until_ready(cost))       # (B, q_pad, n_pad)

    # TODO(synk): linear_sum_assignment (Hungarian) has no Pallas equivalent;
    # it is executed on host, matching the reference's .cpu() + scipy call.
    results = []
    for b in range(B):
        sub = cost[b, :Q, :n_list[b]]      # strip row/column padding
        rows, cols = _linear_sum_assignment(sub)
        results.append((rows.astype(np.int32), cols.astype(np.int32)))
    return results


# ------------------------------ self-test -------------------------------------
def _reference_cost_block(pc, pb, cls_idx, lbb):
    """Pure-numpy reference of one per-batch cost block (mirrors the module)."""
    cost_cls = -pc[:, cls_idx]
    l1 = np.abs(pb[:, None, :] - lbb[None, :, :]).sum(-1)

    def to_corners(b):
        return np.stack([b[:, 0] - 0.5 * b[:, 2], b[:, 1] - 0.5 * b[:, 3],
                         b[:, 0] + 0.5 * b[:, 2], b[:, 1] + 0.5 * b[:, 3]], -1)

    p, l = to_corners(pb), to_corners(lbb)
    area_p = (p[:, 2] - p[:, 0]) * (p[:, 3] - p[:, 1])
    area_l = (l[:, 2] - l[:, 0]) * (l[:, 3] - l[:, 1])
    iw = np.maximum(np.minimum(p[:, None, 2], l[None, :, 2]) -
                    np.maximum(p[:, None, 0], l[None, :, 0]), 0.0)
    ih = np.maximum(np.minimum(p[:, None, 3], l[None, :, 3]) -
                    np.maximum(p[:, None, 1], l[None, :, 1]), 0.0)
    inter = iw * ih
    union = area_p[:, None] + area_l[None, :] - inter
    enc = ((np.maximum(p[:, None, 2], l[None, :, 2]) -
            np.minimum(p[:, None, 0], l[None, :, 0])) *
           (np.maximum(p[:, None, 3], l[None, :, 3]) -
            np.minimum(p[:, None, 1], l[None, :, 1])))
    giou = inter / union - (enc - union) / enc
    return np.clip(W_CLS * cost_cls + W_L1 * l1 - W_GIOU * giou, -1e20, 1e20)


if __name__ == "__main__":
    key = jax.random.PRNGKey(0)
    B, Q, C1 = 2, 8, 5          # batch, queries, classes + 1
    n_instances = [3, 4]        # per-batch ground-truth instance counts

    k1, k2, k3, _ = jax.random.split(key, 4)
    pred_cls = jax.nn.softmax(
        jax.random.normal(k1, (B, Q, C1), dtype=jnp.float32), axis=-1)
    # boxes in (xc, yc, w, h), normalized coords
    pred_bb = jax.random.uniform(k2, (B, Q, 4), dtype=jnp.float32,
                                 minval=0.1, maxval=0.9)

    label_cls, label_bb = [], []
    kk = k3
    for n in n_instances:
        kk, ka, kb = jax.random.split(kk, 3)
        idx = jax.random.randint(ka, (n,), 0, C1)
        label_cls.append(jax.nn.one_hot(idx, C1, dtype=jnp.float32))
        label_bb.append(jax.random.uniform(kb, (n, 4), dtype=jnp.float32,
                                           minval=0.1, maxval=0.9))

    # Numerical check of the kernel's cost blocks against a numpy reference.
    neg_oh, feats, n_list = _prepare_label_tensors(label_cls, label_bb, C1)
    cost_dev = compute_cost_matrices(pred_cls, pred_bb, neg_oh, feats)
    cost_np = np.asarray(jax.block_until_ready(cost_dev))
    pc_np, pb_np = np.asarray(pred_cls), np.asarray(pred_bb)
    for b in range(B):
        cls_idx = np.asarray(jnp.argmax(label_cls[b], axis=-1))
        ref = _reference_cost_block(pc_np[b], pb_np[b], cls_idx,
                                    np.asarray(label_bb[b]))
        np.testing.assert_allclose(cost_np[b, :Q, :n_list[b]], ref,
                                   rtol=1e-3, atol=1e-3)

    out = hungarian_matcher_forward(pred_cls, pred_bb, label_cls, label_bb)

    # Basic sanity: one (pred_idx, label_idx) pair per batch element, correct sizes.
    assert len(out) == B
    for (r, c), n in zip(out, n_instances):
        assert r.shape == (n,) and c.shape == (n,)
        assert r.dtype == np.int32 and c.dtype == np.int32
        assert len(set(r.tolist())) == n          # distinct query indices
        assert sorted(c.tolist()) == list(range(n))

    print("KERNEL_OK")
</pallas_src>

<mosaic_0001>
module attributes {stable_mosaic.version = 11 : i64} {
  func.func @_cost_block_kernel(%arg0: i32, %arg1: i32, %arg2: memref<1x8x5xf32, #tpu.memory_space<vmem>>, %arg3: memref<1x8x4xf32, #tpu.memory_space<vmem>>, %arg4: memref<1x5x128xf32, #tpu.memory_space<vmem>>, %arg5: memref<1x9x128xf32, #tpu.memory_space<vmem>>, %arg6: memref<1x8x128xf32, #tpu.memory_space<vmem>>) attributes {dimension_semantics = [#tpu.dimension_semantics<parallel>, #tpu.dimension_semantics<parallel>], iteration_bounds = array<i64: 2, 1>, scalar_prefetch = 0 : i64, scratch_operands = 0 : i64, tpu.core_type = #tpu.core_type<tc>, window_params = [{transform_indices = @transform_0, window_bounds = array<i64: 1, 8, 5>}, {transform_indices = @transform_1, window_bounds = array<i64: 1, 8, 4>}, {transform_indices = @transform_2, window_bounds = array<i64: 1, 5, 128>}, {transform_indices = @transform_3, window_bounds = array<i64: 1, 9, 128>}, {transform_indices = @transform_4, window_bounds = array<i64: 1, 8, 128>}]} {
    %c0 = arith.constant 0 : index
    %c0_0 = arith.constant 0 : index
    %c0_1 = arith.constant 0 : index
    %0 = vector.load %arg2[%c0, %c0_0, %c0_1] : memref<1x8x5xf32, #tpu.memory_space<vmem>>, vector<1x8x5xf32>
    %1 = vector.shape_cast %0 : vector<1x8x5xf32> to vector<8x5xf32>
    %c0_2 = arith.constant 0 : index
    %c0_3 = arith.constant 0 : index
    %c0_4 = arith.constant 0 : index
    %2 = vector.load %arg4[%c0_2, %c0_3, %c0_4] : memref<1x5x128xf32, #tpu.memory_space<vmem>>, vector<1x5x128xf32>
    %3 = vector.shape_cast %2 : vector<1x5x128xf32> to vector<5x128xf32>
    %cst = arith.constant dense<0.000000e+00> : vector<8x128xf32>
    %4 = tpu.matmul %1, %3, %cst {dimension_numbers = #tpu.dot_dimension_numbers<[1], [0], [0], [1], [0, 0, 1, 1], [], []>} : vector<8x5xf32>, vector<5x128xf32>, vector<8x128xf32> -> vector<8x128xf32>
    %c0_5 = arith.constant 0 : index
    %c0_6 = arith.constant 0 : index
    %c0_7 = arith.constant 0 : index
    %5 = vector.load %arg3[%c0_5, %c0_6, %c0_7] : memref<1x8x4xf32, #tpu.memory_space<vmem>>, vector<1x8x4xf32>
    %6 = vector.shape_cast %5 : vector<1x8x4xf32> to vector<8x4xf32>
    %7 = vector.extract_strided_slice %6 {offsets = [0, 0], sizes = [8, 1], strides = [1, 1]} : vector<8x4xf32> to vector<8x1xf32>
    %8 = vector.extract_strided_slice %6 {offsets = [0, 1], sizes = [8, 1], strides = [1, 1]} : vector<8x4xf32> to vector<8x1xf32>
    %9 = vector.extract_strided_slice %6 {offsets = [0, 2], sizes = [8, 1], strides = [1, 1]} : vector<8x4xf32> to vector<8x1xf32>
    %10 = vector.extract_strided_slice %6 {offsets = [0, 3], sizes = [8, 1], strides = [1, 1]} : vector<8x4xf32> to vector<8x1xf32>
    %cst_8 = arith.constant 5.000000e-01 : f32
    %11 = vector.broadcast %cst_8 : f32 to vector<8x1xf32>
    %12 = arith.mulf %11, %9 : vector<8x1xf32>
    %13 = arith.subf %7, %12 : vector<8x1xf32>
    %cst_9 = arith.constant 5.000000e-01 : f32
    %14 = vector.broadcast %cst_9 : f32 to vector<8x1xf32>
    %15 = arith.mulf %14, %10 : vector<8x1xf32>
    %16 = arith.subf %8, %15 : vector<8x1xf32>
    %cst_10 = arith.constant 5.000000e-01 : f32
    %17 = vector.broadcast %cst_10 : f32 to vector<8x1xf32>
    %18 = arith.mulf %17, %9 : vector<8x1xf32>
    %19 = arith.addf %7, %18 : vector<8x1xf32>
    %cst_11 = arith.constant 5.000000e-01 : f32
    %20 = vector.broadcast %cst_11 : f32 to vector<8x1xf32>
    %21 = arith.mulf %20, %10 : vector<8x1xf32>
    %22 = arith.addf %8, %21 : vector<8x1xf32>
    %23 = arith.subf %19, %13 : vector<8x1xf32>
    %24 = arith.subf %22, %16 : vector<8x1xf32>
    %25 = arith.mulf %23, %24 : vector<8x1xf32>
    %c0_12 = arith.constant 0 : index
    %c0_13 = arith.constant 0 : index
    %c0_14 = arith.constant 0 : index
    %26 = vector.load %arg5[%c0_12, %c0_13, %c0_14] : memref<1x9x128xf32, #tpu.memory_space<vmem>>, vector<1x9x128xf32>
    %27 = vector.shape_cast %26 : vector<1x9x128xf32> to vector<9x128xf32>
    %28 = vector.extract_strided_slice %27 {offsets = [0, 0], sizes = [1, 128], strides = [1, 1]} : vector<9x128xf32> to vector<1x128xf32>
    %29 = vector.extract_strided_slice %27 {offsets = [1, 0], sizes = [1, 128], strides = [1, 1]} : vector<9x128xf32> to vector<1x128xf32>
    %30 = vector.extract_strided_slice %27 {offsets = [2, 0], sizes = [1, 128], strides = [1, 1]} : vector<9x128xf32> to vector<1x128xf32>
    %31 = vector.extract_strided_slice %27 {offsets = [3, 0], sizes = [1, 128], strides = [1, 1]} : vector<9x128xf32> to vector<1x128xf32>
    %32 = vector.extract_strided_slice %27 {offsets = [4, 0], sizes = [1, 128], strides = [1, 1]} : vector<9x128xf32> to vector<1x128xf32>
    %33 = vector.extract_strided_slice %27 {offsets = [5, 0], sizes = [1, 128], strides = [1, 1]} : vector<9x128xf32> to vector<1x128xf32>
    %34 = vector.extract_strided_slice %27 {offsets = [6, 0], sizes = [1, 128], strides = [1, 1]} : vector<9x128xf32> to vector<1x128xf32>
    %35 = vector.extract_strided_slice %27 {offsets = [7, 0], sizes = [1, 128], strides = [1, 1]} : vector<9x128xf32> to vector<1x128xf32>
    %36 = vector.extract_strided_slice %27 {offsets = [8, 0], sizes = [1, 128], strides = [1, 1]} : vector<9x128xf32> to vector<1x128xf32>
    %37 = vector.broadcast %7 : vector<8x1xf32> to vector<8x128xf32>
    %38 = vector.broadcast %28 : vector<1x128xf32> to vector<8x128xf32>
    %39 = arith.subf %37, %38 : vector<8x128xf32>
    %40 = math.absf %39 : vector<8x128xf32>
    %41 = vector.broadcast %8 : vector<8x1xf32> to vector<8x128xf32>
    %42 = vector.broadcast %29 : vector<1x128xf32> to vector<8x128xf32>
    %43 = arith.subf %41, %42 : vector<8x128xf32>
    %44 = math.absf %43 : vector<8x128xf32>
    %45 = arith.addf %40, %44 : vector<8x128xf32>
    %46 = vector.broadcast %9 : vector<8x1xf32> to vector<8x128xf32>
    %47 = vector.broadcast %30 : vector<1x128xf32> to vector<8x128xf32>
    %48 = arith.subf %46, %47 : vector<8x128xf32>
    %49 = math.absf %48 : vector<8x128xf32>
    %50 = arith.addf %45, %49 : vector<8x128xf32>
    %51 = vector.broadcast %10 : vector<8x1xf32> to vector<8x128xf32>
    %52 = vector.broadcast %31 : vector<1x128xf32> to vector<8x128xf32>
    %53 = arith.subf %51, %52 : vector<8x128xf32>
    %54 = math.absf %53 : vector<8x128xf32>
    %55 = arith.addf %50, %54 : vector<8x128xf32>
    %56 = arith.addf %4, %55 : vector<8x128xf32>
    %57 = vector.broadcast %19 : vector<8x1xf32> to vector<8x128xf32>
    %58 = vector.broadcast %34 : vector<1x128xf32> to vector<8x128xf32>
    %59 = arith.minimumf %57, %58 : vector<8x128xf32>
    %60 = vector.broadcast %13 : vector<8x1xf32> to vector<8x128xf32>
    %61 = vector.broadcast %32 : vector<1x128xf32> to vector<8x128xf32>
    %62 = arith.maximumf %60, %61 : vector<8x128xf32>
    %63 = arith.subf %59, %62 : vector<8x128xf32>
    %cst_15 = arith.constant 0.000000e+00 : f32
    %64 = vector.broadcast %cst_15 : f32 to vector<8x128xf32>
    %65 = arith.maximumf %63, %64 : vector<8x128xf32>
    %66 = vector.broadcast %22 : vector<8x1xf32> to vector<8x128xf32>
    %67 = vector.broadcast %35 : vector<1x128xf32> to vector<8x128xf32>
    %68 = arith.minimumf %66, %67 : vector<8x128xf32>
    %69 = vector.broadcast %16 : vector<8x1xf32> to vector<8x128xf32>
    %70 = vector.broadcast %33 : vector<1x128xf32> to vector<8x128xf32>
    %71 = arith.maximumf %69, %70 : vector<8x128xf32>
    %72 = arith.subf %68, %71 : vector<8x128xf32>
    %cst_16 = arith.constant 0.000000e+00 : f32
    %73 = vector.broadcast %cst_16 : f32 to vector<8x128xf32>
    %74 = arith.maximumf %72, %73 : vector<8x128xf32>
    %75 = arith.mulf %65, %74 : vector<8x128xf32>
    %76 = vector.broadcast %25 : vector<8x1xf32> to vector<8x128xf32>
    %77 = vector.broadcast %36 : vector<1x128xf32> to vector<8x128xf32>
    %78 = arith.addf %76, %77 : vector<8x128xf32>
    %79 = arith.subf %78, %75 : vector<8x128xf32>
    %80 = tpu.reciprocal %79 {approx = true} : vector<8x128xf32> -> vector<8x128xf32>
    %81 = arith.mulf %79, %80 : vector<8x128xf32>
    %cst_17 = arith.constant 2.000000e+00 : f32
    %82 = vector.broadcast %cst_17 : f32 to vector<8x128xf32>
    %83 = arith.subf %82, %81 : vector<8x128xf32>
    %84 = arith.mulf %80, %83 : vector<8x128xf32>
    %85 = arith.mulf %75, %84 : vector<8x128xf32>
    %86 = arith.subf %56, %85 : vector<8x128xf32>
    %87 = vector.broadcast %19 : vector<8x1xf32> to vector<8x128xf32>
    %88 = vector.broadcast %34 : vector<1x128xf32> to vector<8x128xf32>
    %89 = arith.maximumf %87, %88 : vector<8x128xf32>
    %90 = vector.broadcast %13 : vector<8x1xf32> to vector<8x128xf32>
    %91 = vector.broadcast %32 : vector<1x128xf32> to vector<8x128xf32>
    %92 = arith.minimumf %90, %91 : vector<8x128xf32>
    %93 = arith.subf %89, %92 : vector<8x128xf32>
    %94 = vector.broadcast %22 : vector<8x1xf32> to vector<8x128xf32>
    %95 = vector.broadcast %35 : vector<1x128xf32> to vector<8x128xf32>
    %96 = arith.maximumf %94, %95 : vector<8x128xf32>
    %97 = vector.broadcast %16 : vector<8x1xf32> to vector<8x128xf32>
    %98 = vector.broadcast %33 : vector<1x128xf32> to vector<8x128xf32>
    %99 = arith.minimumf %97, %98 : vector<8x128xf32>
    %100 = arith.subf %96, %99 : vector<8x128xf32>
    %101 = arith.mulf %93, %100 : vector<8x128xf32>
    %102 = tpu.reciprocal %101 {approx = true} : vector<8x128xf32> -> vector<8x128xf32>
    %103 = arith.mulf %101, %102 : vector<8x128xf32>
    %cst_18 = arith.constant 2.000000e+00 : f32
    %104 = vector.broadcast %cst_18 : f32 to vector<8x128xf32>
    %105 = arith.subf %104, %103 : vector<8x128xf32>
    %106 = arith.mulf %102, %105 : vector<8x128xf32>
    %107 = arith.mulf %79, %106 : vector<8x128xf32>
    %cst_19 = arith.constant 1.000000e+00 : f32
    %108 = vector.broadcast %cst_19 : f32 to vector<8x128xf32>
    %109 = arith.subf %108, %107 : vector<8x128xf32>
    %110 = arith.addf %86, %109 : vector<8x128xf32>
    %cst_20 = arith.constant -1.000000e+20 : f32
    %cst_21 = arith.constant 1.000000e+20 : f32
    %111 = vector.broadcast %cst_20 : f32 to vector<8x128xf32>
    %112 = arith.maximumf %111, %110 : vector<8x128xf32>
    %113 = vector.broadcast %cst_21 : f32 to vector<8x128xf32>
    %114 = arith.minimumf %113, %112 : vector<8x128xf32>
    %c0_22 = arith.constant 0 : index
    %c0_23 = arith.constant 0 : index
    %c0_24 = arith.constant 0 : index
    %115 = vector.load %arg6[%c0_22, %c0_23, %c0_24] : memref<1x8x128xf32, #tpu.memory_space<vmem>>, vector<1x8x128xf32>
    %116 = vector.shape_cast %115 : vector<1x8x128xf32> to vector<8x128xf32>
    %117 = vector.shape_cast %114 : vector<8x128xf32> to vector<1x8x128xf32>
    tpu.vector_store %arg6[%c0_22, %c0_23, %c0_24], %117 {strides = array<i32>} : memref<1x8x128xf32, #tpu.memory_space<vmem>>, vector<1x8x128xf32>,
    return
  }
  func.func @transform_0(%arg0: i32, %arg1: i32) -> (i32, i32, i32) {
    %c0_i32 = arith.constant 0 : i32
    %c0_i32_0 = arith.constant 0 : i32
    return %arg0, %arg1, %c0_i32 : i32, i32, i32
  }
  func.func @transform_1(%arg0: i32, %arg1: i32) -> (i32, i32, i32) {
    %c0_i32 = arith.constant 0 : i32
    %c0_i32_0 = arith.constant 0 : i32
    return %arg0, %arg1, %c0_i32 : i32, i32, i32
  }
  func.func @transform_2(%arg0: i32, %arg1: i32) -> (i32, i32, i32) {
    %c0_i32 = arith.constant 0 : i32
    %c0_i32_0 = arith.constant 0 : i32
    %c0_i32_1 = arith.constant 0 : i32
    return %arg0, %c0_i32, %c0_i32_0 : i32, i32, i32
  }
  func.func @transform_3(%arg0: i32, %arg1: i32) -> (i32, i32, i32) {
    %c0_i32 = arith.constant 0 : i32
    %c0_i32_0 = arith.constant 0 : i32
    %c0_i32_1 = arith.constant 0 : i32
    return %arg0, %c0_i32, %c0_i32_0 : i32, i32, i32
  }
  func.func @transform_4(%arg0: i32, %arg1: i32) -> (i32, i32, i32) {
    %c0_i32 = arith.constant 0 : i32
    %c0_i32_0 = arith.constant 0 : i32
    return %arg0, %arg1, %c0_i32 : i32, i32, i32
  }
}

</mosaic_0001>

<bundles_post_ra>
// kernel: tpu_custom_call.1
= control target key start
LH: loop header
LB: loop body
LE: loop exit
PB: predicated region body
PF: predicated region fallthrough
CT: control target
= control target key end

     0   :  { %9 = vsyncpa [#allocation3], 0  ;;  %s955_s0 = inlined_call_operand.vmem [shape: f32[2,8,5], index: 0, kind: input, shape index: {}]   ;;  %s956_s1 = inlined_call_operand.vmem [shape: f32[2,8,4], index: 1, kind: input, shape index: {}]   ;;  %s957_s2 = inlined_call_operand.vmem [shape: f32[2,5,128], index: 2, kind: input, shape index: {}]   ;;  %s958_s3 = inlined_call_operand.vmem [shape: f32[2,9,128], index: 3, kind: input, shape index: {}]   ;;  %s959_s4 = inlined_call_operand.hbm [shape: f32[2,8,128], index: 4, kind: output, shape index: {}]  }
   0x1   :  { %11 = vsyncpa [#allocation3 + $0x1], 0  ;;  %s840_s15 = smov 0   ;;  %s842_s16 = smov 0  }
   0x2   :  { %s844_s17 = smov 0   ;;  %s846_s18 = smov 0  }
   0x3   :  { %s848_s19 = smov 0   ;;  %s850_s20 = smov 0  }
   0x4 LB: > { %s625_s21 = sadd.s32 4294967295, %s804_s20   ;;  %s626_s22 = sadd.s32 4294967294, %s804_s20   ;;  %s804_s20 = sphi %s850_s20, %s17_s20   ;;  %s800_s19 = sphi %s848_s19, %s966_s19   ;;  %s796_s18 = sphi %s846_s18, %s965_s18   ;;  %s792_s17 = sphi %s844_s17, %s964_s17   ;;  %s788_s16 = sphi %s842_s16, %s963_s16   ;;  %s784_s15 = sphi %s840_s15, %s962_s15  }
   0x5   : > { %s29_s23 = sadd.s32 1, %s800_s19  ;;  %s146_s24 = sadd.s32 1, %s792_s17 }
   0x6   : > { %p31_p0 = scmp.ge.s32.totalorder %s29_s23, 2  ;;  %p156_p1 = scmp.ne.s32.totalorder %s792_s17, %s788_s16 }
   0x7   : > { %p157_p2 = scmp.eq.s32.totalorder %s625_s21, 1  ;;  %p162_p3 = scmp.ne.s32.totalorder %s788_s16, %s784_s15 }
   0x8   : > { %s968_s23 = smov (%p31_p0, %s29_s23), 0  ;;  %p163_p5 = scmp.eq.s32.totalorder %s626_s22, 1 }
   0x9   : > { %p880_p4 = por %p157_p2, %p156_p1  ;;  %s141_s26 = ssub.s32 %s800_s19, %s968_s23 }
   0xa   : > { %p629_p6 = scmp.ge.s32.totalorder %s804_s20, 1  ;;  %p144_p7 = scmp.eq.s32.totalorder %s141_s26, 0 }
   0xb   : > { %p887_p8 = por %p163_p5, %p162_p3  ;;  %p216_p9 = scmp.lt.s32.totalorder %s804_s20, 3 }
   0xc   : > { %s893_s28 = scalar_select %p144_p7, %s792_s17, %s146_s24  }
   0xd   : > { %p217_p10 = pnand %p629_p6, %p216_p9 }
   0xe   : > { %p260_p11 = scmp.lt.s32.totalorder (!%p217_p10), %s796_s18, 1  ;;  %s810_s14 = smov (!%p217_p10), 126  }
   0xf   : > { %220 = sbr.rel (%p217_p10) target bundleno = 432 (0x1b0), region = 36  ;;  %s811_s21 = smov (!%p217_p10), 127  }
  0x10   : > { %s641_s6 = sshll.u32 (!%p217_p10), %s796_s18, 7 }
  0x11   : > { %s513_s11 = scalar_lea.hbm (!%p217_p10), %s959_s4, %s641_s6 }
  0x14   : > { %v806_v0 = vmov 0   ;;  %s897_s29 = scalar_select %p260_p11, %s796_s18, 1  ;;  %v807_v1 = vmov 1   ;;  %vm349_vm0 = vcmask 1044480   ;;  %v808_v4 = vmov 0.0  }
  0x15   : > { %715 = vset.pattern.permute.xlu1 %v806_v0  ;;  %716 = vset.pattern.permute.xlu0 %v807_v1  ;;  %vm809_vm1 = vmmov 0   ;;  %vm345_vm2 = vcmask 39936   ;;  %v812_v11 = vmov 3   ;;  %v813_v14 = vmov 2  }
  0x16   : > { %s631_s30 = sshll.u32 %s897_s29, 3  ;;  %647 = vmatprep.subr.mxu0 %v808_v4  ;;  %649 = vmatprep.mubr.msk.f32.mxu0 %vm809_vm1, %v808_v4  ;;  %v306_v18 = vlaneseq  ;;  %s644_s22 = sshll.u32 %s897_s29, 4 }
  0x17   : > { %s273_s7 = scalar_lea.vmem %s956_s1, %s631_s30  ;;  %s277_s10 = scalar_lea.vmem %s957_s2, %s631_s30 }
  0x18   : > { %v285_v2 = vld [vmem:[%s273_s7] sm:$0xff]  ;;  %s266_s13 = scalar_lea.vmem %s955_s0, %s631_s30  ;;  %v307_v19 = vshrl.u32 %v306_v18, 7  ;;  %s282_s30 = scalar_lea.vmem %s958_s3, %s644_s22 }
  0x19   : > { %v286_v3 = vmul.f32 0.5, %v285_v2  ;;  %v284_v5 = vld [vmem:[%s277_s10] sm:$0x1f]  ;;  %v638_v47 = vld [vmem:[%s282_s30 + $0x8] ss:$0 sm:$0xff]  ;;  %s257_s29 = sand.u32 1, %s788_s16  }
  0x1a   : > { %v283_v6 = vld [vmem:[%s266_s13] sm:$0xff]  ;;  %648 = vmatpush3.msk.msra.mxu0 %vm349_vm0, %v284_v5  ;;  %v460_v21 = vsub.s32 5, %v307_v19  ;;  %v440_v22 = vsub.s32 4, %v307_v19  ;;  %v451_v23 = vsub.s32 7, %v307_v19  ;;  %v430_v25 = vsub.s32 6, %v307_v19  ;;  %s630_s5 = sshll.u32 %s257_s29, 3 }
  0x1b   : > { %288 = vrot.lane.b32.xlu0 %v286_v3, %s810_s14  ;;  %650 = vmatmul.mubr.msk.f32.vlgmr.msra.gmra.mxu0 %vm345_vm2, %v283_v6  ;;  %v299_v24 = vld [vmem:[%s282_s30] sm:$0xff]  ;;  %v308_v46 = vsub.s32 0, %v307_v19  ;;  %v318_v48 = vsub.s32 1, %v307_v19  ;;  %v329_v57 = vsub.s32 2, %v307_v19  ;;  %v340_v60 = vsub.s32 3, %v307_v19  ;;  %s259_s7 = scalar_lea.vmem [#allocation2], %s630_s5 }
  0x1c   : > { %v461_v26 = vrot.slane %v299_v24, %v460_v21  ;;  %v441_v28 = vrot.slane %v299_v24, %v440_v22  ;;  %v452_v29 = vrot.slane %v299_v24, %v451_v23  ;;  %v431_v31 = vrot.slane %v299_v24, %v430_v25  ;;  %s515_s8 = sshll.u32 %s259_s7, 4  ;;  %s501_s12 = scalar_lea.sflag [#allocation3], %s257_s29  ;;  %s516_s8 = int_to_ptr.vmem [resolvable:$true] %s515_s8 }
  0x1d   : > { %v309_v53 = vrot.slane %v299_v24, %v308_v46  ;;  %v319_v54 = vrot.slane %v299_v24, %v318_v48  ;;  %v330_v62 = vrot.slane %v299_v24, %v329_v57  ;;  %s728_s13 = scalar_lea.vmem %s516_s8, 128  ;;  %s814_s14 = smov [#allocation2]  }
  0x1e   : > { %p729_p12 = scmp.ne.s32.totalorder %s516_s8, %s728_s13 }
  0x20   : > { %p730_p13 = pnand %p729_p12, %p880_p4 }
  0x22   : > { %p731_p0 = pneg %p730_p13 }
  0x8d   : > { %v289_v7 = vpop.permute.xlu0 %288 }
  0x8e   : > { %v291_v8 = vsub.f32 %v285_v2, %v289_v7  ;;  %v292_v9 = vadd.f32 %v289_v7, %v285_v2 }
  0x90   : > { %425 = vperm.xlu1 %715, %v292_v9   ;;  %v293_v10 = vsub.f32 %v292_v9, %v291_v8 }
  0x92   : > { %295 = vrot.lane.b32.xlu0 %v293_v10, %s811_s21  ;;  %s732_s21 = sshll.u32 %s814_s14, 4  ;;  %s733_s21 = int_to_ptr.vmem [resolvable:$false] %s732_s21 }
  0x93   : > { %s734_s18 = scalar_lea.vmem %s733_s21, 256  ;;  %p735_p1 = scmp.lt.s32.totalorder %s516_s8, %s733_s21 }
  0x94   : > { %435 = vperm.xlu1 %715, %v291_v8   ;;  %p736_p2 = scmp.lt.s32.totalorder %s734_s18, %s728_s13 }
  0x96   : > { %446 = vperm.xlu0 %716, %v292_v9   ;;  %p737_p3 = por %p736_p2, %p735_p1 }
  0x98   : > { %717 = vset.pattern.permute.xlu1 %v807_v1  ;;  %p738_p5 = pnand %p737_p3, %p731_p0 }
  0x99   : > { %455 = vperm.xlu1 %717, %v291_v8  }
  0x9a   : > { %719 = vset.pattern.permute.xlu0 %v806_v0 }
  0x9b   : > { %303 = vperm.xlu0 %719, %v285_v2  }
  0x9d   : > { %718 = vset.pattern.permute.xlu1 %v806_v0 }
  0x9f   : > { %722 = vset.pattern.permute.xlu0 %v812_v11 }
  0xa0   : > { %335 = vperm.xlu0 %722, %v285_v2  }
  0xa4   : > { %723 = vset.pattern.permute.xlu0 %v806_v0 }
  0xdb   : > { %v909_v15 = vpop.f32.mrf.mxu0 }
  0xdd   : > { %v651_v16 = vpop.f32.mrf.mxu0 }
 0x104   : > { %v296_v12 = vpop.permute.xlu0 %295 }
 0x105   : > { %v298_v13 = vmul.f32 %v296_v12, %v293_v10 }
 0x107   : > { %468 = vperm.xlu1 %718, %v298_v13  }
 0x10b   : > { %720 = vset.pattern.permute.xlu1 %v807_v1  ;;  %v426_v17 = vpop.permute.xlu1 %425  ;;  %v341_v1 = vrot.slane %v299_v24, %v340_v60 }
 0x10c   : > { %313 = vperm.xlu1 %720, %v285_v2   ;;  %v483_v35 = vmax.f32 %v426_v17, %v431_v31  ;;  %v432_v41 = vmin.f32 %v426_v17, %v431_v31 }
 0x10f   : > { %v436_v20 = vpop.permute.xlu1 %435 }
 0x110   : > { %721 = vset.pattern.permute.xlu1 %v813_v14  ;;  %v484_v33 = vmin.f32 %v436_v20, %v441_v28  ;;  %v442_v38 = vmax.f32 %v436_v20, %v441_v28 }
 0x111   : > { %324 = vperm.xlu1 %721, %v285_v2   ;;  %v447_v30 = vpop.permute.xlu0 %446 }
 0x112   : > { %v486_v34 = vmax.f32 %v447_v30, %v452_v29  ;;  %v485_v39 = vsub.f32 %v483_v35, %v484_v33  ;;  %v453_v40 = vmin.f32 %v447_v30, %v452_v29  ;;  %v443_v44 = vsub.f32 %v432_v41, %v442_v38 }
 0x114   : > { %v456_v27 = vpop.permute.xlu1 %455  ;;  %v444_v49 = vmax.f32 %v443_v44, 0.0 }
 0x115   : > { %v487_v32 = vmin.f32 %v456_v27, %v461_v26  ;;  %v462_v36 = vmax.f32 %v456_v27, %v461_v26 }
 0x116   : > { %v304_v55 = vpop.permute.xlu0 %303 }
 0x117   : > { %v488_v37 = vsub.f32 %v486_v34, %v487_v32  ;;  %v463_v42 = vsub.f32 %v453_v40, %v462_v36  ;;  %v310_v59 = vsub.f32 %v304_v55, %v309_v53 }
 0x119   : > { %v489_v43 = vmul.f32 %v488_v37, %v485_v39  ;;  %v464_v45 = vmax.f32 %v463_v42, 0.0  ;;  %v311_v0 = vand.u32 2147483647, %v310_v59 }
 0x11b   : > { %724 = vrcp.f32 %v489_v43  ;;  %v465_v51 = vmul.f32 %v464_v45, %v444_v49  ;;  %v336_v4 = vpop.permute.xlu0 %335 }
 0x11c   : > { %v342_v9 = vsub.f32 %v336_v4, %v341_v1 }
 0x11e   : > { %v343_v12 = vand.u32 2147483647, %v342_v9 }
 0x128   : > { %v725_v2 = vpop.eup %724 }
 0x129   : > { %v491_v6 = vmul.f32 %v725_v2, %v489_v43 }
 0x12b   : > { %v492_v10 = vsub.f32 2.0, %v491_v6 }
 0x12d   : > { %v493_v18 = vmul.f32 %v725_v2, %v492_v10 }
 0x182   : > { %v469_v50 = vpop.permute.xlu1 %468 }
 0x183   : > { %v475_v52 = vadd.f32 %v638_v47, %v469_v50 }
 0x185   : > { %v476_v56 = vsub.f32 %v475_v52, %v465_v51 }
 0x187   : > { %726 = vrcp.f32 %v476_v56  ;;  %v314_v58 = vpop.permute.xlu1 %313  ;;  %v494_v20 = vmul.f32 %v493_v18, %v476_v56 }
 0x188   : > { %v320_v61 = vsub.f32 %v314_v58, %v319_v54 }
 0x189   : > { %v495_v24 = vsub.f32 1.0, %v494_v20 }
 0x18a   : > { %v321_v63 = vand.u32 2147483647, %v320_v61 }
 0x18c   : > { %v325_v3 = vpop.permute.xlu1 %324  ;;  %v322_v7 = vadd.f32 %v321_v63, %v311_v0 }
 0x18d   : > { %v331_v5 = vsub.f32 %v325_v3, %v330_v62 }
 0x18f   : > { %v332_v8 = vand.u32 2147483647, %v331_v5 }
 0x191   : > { %v333_v11 = vadd.f32 %v332_v8, %v322_v7 }
 0x193   : > { %v344_v17 = vadd.f32 %v343_v12, %v333_v11 }
 0x194   : > { %v727_v13 = vpop.eup %726 }
 0x195   : > { %v478_v14 = vmul.f32 %v727_v13, %v476_v56  ;;  %v420_v21 = vadd.f32 %v909_v15, %v344_v17 }
 0x197   : > { %v479_v16 = vsub.f32 2.0, %v478_v14 }
 0x199   : > { %v480_v19 = vmul.f32 %v727_v13, %v479_v16 }
 0x19b   : > { %v481_v22 = vmul.f32 %v480_v19, %v465_v51 }
 0x19d   : > { %v482_v23 = vsub.f32 %v420_v21, %v481_v22 }
 0x19f   : > { %v496_v25 = vadd.f32 %v495_v24, %v482_v23 }
 0x1a1   : > { %v639_v26 = vclamps-f32 %v496_v25, 1e+20 }
 0x1a3   : > { %499 = vst [vmem:[%s259_s7] sm:$0xff] %v639_v26 }
 0x1a4   : > { %741 = shalt.err (!%p738_p5)
}
 0x1a5   : > { %s742_s22 = scalar_lea.hbm %s513_s11, 128  ;;  %s746_s30 = scalar_lea.hbm %s959_s4, 256 }
 0x1a6   : > { %p743_p6 = scmp.ne.s32.totalorder %s513_s11, %s742_s22  ;;  %p747_p10 = scmp.lt.s32.totalorder %s513_s11, %s959_s4 }
 0x1a7   : > { %p748_p11 = scmp.lt.s32.totalorder %s746_s30, %s742_s22 }
 0x1a8   : > { %p744_p7 = pnand %p743_p6, %p880_p4 }
 0x1a9   : > { %p749_p12 = por %p748_p11, %p747_p10 }
 0x1aa   : > { %p745_p9 = pneg %p744_p7 }
 0x1ac   : > { %p750_p13 = pnand %p749_p12, %p745_p9 }
 0x1ae   : > { %753 = shalt.err (!%p750_p13)
}
 0x1af   : > { %652 = dma.vmem_to_hbm [thread:$0]  (%p880_p4), %s516_s8, 128, %s513_s11, %s501_s12  }
 0x1b0 PF: > { %p658_p0 = scmp.ge.s32.totalorder %s804_s20, 2  ;;  %s527_s6 = sand.u32 1, %s784_s15  }
 0x1b1   : > { %s528_s7 = scalar_lea.sflag [#allocation3], %s527_s6 }
 0x1b2   : > { %p655_p1 = pnand %p658_p0, %p887_p8 }
 0x1b4   : > { %p656_p2 = pneg %p655_p1 }
 0x1b6   : > { %779 = dma.done.wait (%p656_p2), %s528_s7, 128  }
 0x1b7   : > { %781 = vsyncadd (%p656_p2), %s528_s7, 4294967168  ;;  %s17_s20 = sadd.s32 1, %s804_s20   ;;  %s962_s15 = smov %s788_s16 }
 0x1b8   : > { %p14_p3 = scmp.ge.s32.totalorder %s17_s20, 4   ;;  %s963_s16 = smov %s792_s17 }
 0x1b9   : > { %s964_s17 = smov %s893_s28  ;;  %s965_s18 = smov %s800_s19 }
 0x1ba   : > { %s966_s19 = smov %s968_s23  ;;  %16 = sbr.rel (!%p14_p3) target bundleno = 4 (0x4), region = 80 }
 0x1bf   :  { %533 = vsyncpa [#allocation3], 1 }
 0x1c0   :  { %535 = vsyncpa [#allocation3 + $0x1], 1 }

</bundles_post_ra>
